<compile_context>
chip_gen: v7x
topology: tpu7x:2x2x1
jax: 0.10.0
libtpu: 0.0.40
codegen_flags: <defaults>
</compile_context>

<pallas_src>
import functools

import jax
import jax.numpy as jnp
from jax.experimental import pallas as pl
from jax.experimental.pallas import tpu as pltpu

NUM_FEATURES = 100
PAD = 128            # lane/sublane-padded hidden dimension
OUT_PAD = 8          # output rows padded to one sublane group (2 real rows)
MAX_BATCH_TILE = 2048  # batch columns per grid step (multiple of 128); sweepable


def _round_up(n, m):
    return ((n + m - 1) // m) * m


def _cdiv(a, b):
    return -(-a // b)


def _pick_act_dtype():
    """bf16 activations/tanh on v6e/v7x (native bf16 VPU/EUP), f32 elsewhere."""
    try:
        kind = jax.devices()[0].device_kind.lower()
    except Exception:
        return "float32"
    if "v6" in kind or "v7" in kind:
        return "bfloat16"
    return "float32"


def _choose_tiling(n):
    """Pick (batch_tile, padded_batch, num_steps) for the lane-major layout."""
    n_128 = _round_up(max(n, 1), 128)
    num_steps = max(1, _cdiv(n_128, MAX_BATCH_TILE))
    if n_128 >= 2 * 128:
        # v7x has 2 TensorCores; the parallel batch axis is what shards across
        # them, so keep an even number of (>= 2) grid steps when possible.
        num_steps = max(num_steps, 2)
        if num_steps % 2:
            num_steps += 1
    bt = _round_up(_cdiv(n_128, num_steps), 128)
    return bt, bt * num_steps, num_steps


def _mlp_kernel(x_ref, w1_ref, b1_ref, w2t_ref, b2_ref, w3t_ref, b3_ref, o_ref,
                *, act_dtype):
    # x_ref  : (1, BT)        f32   batch along lanes (lane-dense input)
    # w1_ref : (PAD, 1)       f32   layer-1 weights along sublanes
    # b1_ref : (PAD, 1)       f32
    # w2t_ref: (PAD, PAD)     bf16  W2^T  (output features on sublanes)
    # b2_ref : (PAD, 1)       f32
    # w3t_ref: (OUT_PAD, PAD) bf16  W3^T  (rows 0:2 real, rest zero)
    # b3_ref : (OUT_PAD, 1)   f32
    # o_ref  : (OUT_PAD, BT)  f32   lane-dense output
    act = jnp.bfloat16 if act_dtype == "bfloat16" else jnp.float32

    x = x_ref[...].astype(act)                       # (1, BT)
    w1 = w1_ref[...].astype(act)                     # (PAD, 1)
    b1 = b1_ref[...].astype(act)                     # (PAD, 1)

    # Layer 1: K == 1 -> outer-product broadcast FMA on the VPU (no MXU).
    h1 = jnp.tanh(w1 * x + b1)                       # (PAD, BT) act dtype

    # Layer 2: the only real GEMM. bf16 MXU inputs, f32 accumulation.
    h2_pre = jnp.dot(w2t_ref[...], h1.astype(jnp.bfloat16),
                     preferred_element_type=jnp.float32) + b2_ref[...]
    h2 = jnp.tanh(h2_pre.astype(act))                # (PAD, BT)

    # Layer 3: tiny (OUT_PAD, PAD) x (PAD, BT) projection.
    out = jnp.dot(w3t_ref[...], h2.astype(jnp.bfloat16),
                  preferred_element_type=jnp.float32) + b3_ref[...]
    o_ref[...] = out.astype(o_ref.dtype)             # (OUT_PAD, BT)


def prepare_params(params, num_features=NUM_FEATURES):
    """One-time padding / transposition / bf16 cast (hoisted out of the call path)."""
    w1, b1, w2, b2, w3, b3 = params   # stored as (in, out) / (out,)
    w1t = jnp.zeros((PAD, 1), jnp.float32).at[:num_features, 0].set(
        w1.reshape(num_features).astype(jnp.float32))
    b1t = jnp.zeros((PAD, 1), jnp.float32).at[:num_features, 0].set(
        b1.astype(jnp.float32))
    w2t = (jnp.zeros((PAD, PAD), jnp.float32)
           .at[:num_features, :num_features].set(w2.T.astype(jnp.float32))
           ).astype(jnp.bfloat16)
    b2t = jnp.zeros((PAD, 1), jnp.float32).at[:num_features, 0].set(
        b2.astype(jnp.float32))
    w3t = (jnp.zeros((OUT_PAD, PAD), jnp.float32)
           .at[:2, :num_features].set(w3.T.astype(jnp.float32))
           ).astype(jnp.bfloat16)
    b3t = jnp.zeros((OUT_PAD, 1), jnp.float32).at[:2, 0].set(
        b3.astype(jnp.float32))
    return (w1t, b1t, w2t, b2t, w3t, b3t)


@functools.partial(jax.jit, static_argnames=("act_dtype",))
def small_nn_forward(x, prepared, act_dtype="float32"):
    """x: (N, 1) float32 -> (N, 2) float32, same semantics as Small_NN.forward."""
    w1t, b1t, w2t, b2t, w3t, b3t = prepared
    n = x.shape[0]
    bt, n_pad, num_steps = _choose_tiling(n)

    # Lane-dense input: (N, 1) -> (1, N) is a free contiguous reinterpretation.
    x_row = x.reshape(1, n).astype(jnp.float32)
    if n_pad != n:
        x_row = jnp.pad(x_row, ((0, 0), (0, n_pad - n)))

    full = lambda i: (0, 0)   # weights / biases: same whole-array block each step

    out_t = pl.pallas_call(
        functools.partial(_mlp_kernel, act_dtype=act_dtype),
        out_shape=jax.ShapeDtypeStruct((OUT_PAD, n_pad), jnp.float32),
        grid_spec=pltpu.PrefetchScalarGridSpec(
            num_scalar_prefetch=0,
            grid=(num_steps,),
            in_specs=[
                pl.BlockSpec((1, bt), lambda i: (0, i)),      # x (lane-dense)
                pl.BlockSpec((PAD, 1), full),                 # w1 column
                pl.BlockSpec((PAD, 1), full),                 # b1
                pl.BlockSpec((PAD, PAD), full),               # W2^T (bf16)
                pl.BlockSpec((PAD, 1), full),                 # b2
                pl.BlockSpec((OUT_PAD, PAD), full),           # W3^T (bf16)
                pl.BlockSpec((OUT_PAD, 1), full),             # b3
            ],
            out_specs=pl.BlockSpec((OUT_PAD, bt), lambda i: (0, i)),
        ),
        compiler_params=pltpu.CompilerParams(
            dimension_semantics=("parallel",)
        ),
    )(x_row, w1t, b1t, w2t, b2t, w3t, b3t)

    # Un-transpose: keep only the 2 real output rows and the N real columns.
    return out_t[:2, :n].T


def init_params(key, num_features=NUM_FEATURES):
    """Deterministic init mimicking PyTorch nn.Linear default (uniform +/- 1/sqrt(fan_in))."""
    ks = jax.random.split(key, 6)

    def uinit(k, shape, fan_in):
        bound = 1.0 / jnp.sqrt(fan_in)
        return jax.random.uniform(k, shape, jnp.float32, -bound, bound)

    # Stored as (in, out) so the reference does x @ W (PyTorch stores (out, in)).
    w1 = uinit(ks[0], (1, num_features), 1.0)
    b1 = uinit(ks[1], (num_features,), 1.0)
    w2 = uinit(ks[2], (num_features, num_features), float(num_features))
    b2 = uinit(ks[3], (num_features,), float(num_features))
    w3 = uinit(ks[4], (num_features, 2), float(num_features))
    b3 = uinit(ks[5], (2,), float(num_features))
    return (w1, b1, w2, b2, w3, b3)


def reference_forward(x, params):
    w1, b1, w2, b2, w3, b3 = params
    h1 = jnp.tanh(x @ w1 + b1)
    h2 = jnp.tanh(h1 @ w2 + b2)
    return h2 @ w3 + b3


if __name__ == "__main__":
    key = jax.random.PRNGKey(0)
    k_param, k_x1, k_x2 = jax.random.split(key, 3)
    params = init_params(k_param, NUM_FEATURES)
    prepared = prepare_params(params, NUM_FEATURES)   # one-time padding/casts
    act_dtype = _pick_act_dtype()                     # bf16 tanh on v6e/v7x only

    # Primary small-shape check (single grid step).
    batch = 16
    x = jax.random.normal(k_x1, (batch, 1), jnp.float32)
    out = jax.block_until_ready(small_nn_forward(x, prepared, act_dtype=act_dtype))
    ref = reference_forward(x, params)
    assert out.shape == (batch, 2), out.shape
    # bf16 MXU inputs (+ bf16 activations on v6e/v7x) with f32 accumulation
    # -> loosened tolerance vs the pure-f32 reference.
    assert jnp.allclose(out, ref, atol=5e-2, rtol=5e-2), (
        float(jnp.max(jnp.abs(out - ref)))
    )

    # Secondary check exercising the multi-step (grid >= 2) + batch-padding path.
    batch2 = 1000
    x2 = jax.random.normal(k_x2, (batch2, 1), jnp.float32)
    out2 = jax.block_until_ready(small_nn_forward(x2, prepared, act_dtype=act_dtype))
    ref2 = reference_forward(x2, params)
    assert out2.shape == (batch2, 2), out2.shape
    assert jnp.allclose(out2, ref2, atol=5e-2, rtol=5e-2), (
        float(jnp.max(jnp.abs(out2 - ref2)))
    )

    print("KERNEL_OK")
</pallas_src>

<mosaic_0001>
module attributes {stable_mosaic.version = 11 : i64} {
  func.func @_mlp_kernel(%arg0: i32, %arg1: memref<1x128xf32, #tpu.memory_space<vmem>>, %arg2: memref<128x1xf32, #tpu.memory_space<vmem>>, %arg3: memref<128x1xf32, #tpu.memory_space<vmem>>, %arg4: memref<128x128xbf16, #tpu.memory_space<vmem>>, %arg5: memref<128x1xf32, #tpu.memory_space<vmem>>, %arg6: memref<8x128xbf16, #tpu.memory_space<vmem>>, %arg7: memref<8x1xf32, #tpu.memory_space<vmem>>, %arg8: memref<8x128xf32, #tpu.memory_space<vmem>>) attributes {dimension_semantics = [#tpu.dimension_semantics<parallel>], iteration_bounds = array<i64: 1>, scalar_prefetch = 0 : i64, scratch_operands = 0 : i64, tpu.core_type = #tpu.core_type<tc>, window_params = [{transform_indices = @transform_0, window_bounds = array<i64: 1, 128>}, {pipeline_mode = #tpu.pipeline_mode<synchronous>, transform_indices = @transform_1, window_bounds = array<i64: 128, 1>}, {pipeline_mode = #tpu.pipeline_mode<synchronous>, transform_indices = @transform_2, window_bounds = array<i64: 128, 1>}, {pipeline_mode = #tpu.pipeline_mode<synchronous>, transform_indices = @transform_3, window_bounds = array<i64: 128, 128>}, {pipeline_mode = #tpu.pipeline_mode<synchronous>, transform_indices = @transform_4, window_bounds = array<i64: 128, 1>}, {pipeline_mode = #tpu.pipeline_mode<synchronous>, transform_indices = @transform_5, window_bounds = array<i64: 8, 128>}, {pipeline_mode = #tpu.pipeline_mode<synchronous>, transform_indices = @transform_6, window_bounds = array<i64: 8, 1>}, {transform_indices = @transform_7, window_bounds = array<i64: 8, 128>}]} {
    %c0 = arith.constant 0 : index
    %c0_0 = arith.constant 0 : index
    %0 = vector.load %arg1[%c0, %c0_0] : memref<1x128xf32, #tpu.memory_space<vmem>>, vector<1x128xf32>
    %c0_1 = arith.constant 0 : index
    %c0_2 = arith.constant 0 : index
    %1 = vector.load %arg2[%c0_1, %c0_2] : memref<128x1xf32, #tpu.memory_space<vmem>>, vector<128x1xf32>
    %c0_3 = arith.constant 0 : index
    %c0_4 = arith.constant 0 : index
    %2 = vector.load %arg3[%c0_3, %c0_4] : memref<128x1xf32, #tpu.memory_space<vmem>>, vector<128x1xf32>
    %3 = vector.broadcast %1 : vector<128x1xf32> to vector<128x128xf32>
    %4 = vector.broadcast %0 : vector<1x128xf32> to vector<128x128xf32>
    %5 = arith.mulf %3, %4 : vector<128x128xf32>
    %6 = vector.broadcast %2 : vector<128x1xf32> to vector<128x128xf32>
    %7 = arith.addf %5, %6 : vector<128x128xf32>
    %8 = math.tanh %7 : vector<128x128xf32>
    %c0_5 = arith.constant 0 : index
    %c0_6 = arith.constant 0 : index
    %9 = vector.load %arg4[%c0_5, %c0_6] : memref<128x128xbf16, #tpu.memory_space<vmem>>, vector<128x128xbf16>
    %10 = arith.truncf %8 : vector<128x128xf32> to vector<128x128xbf16>
    %cst = arith.constant dense<0.000000e+00> : vector<128x128xf32>
    %11 = tpu.matmul %9, %10, %cst {dimension_numbers = #tpu.dot_dimension_numbers<[1], [0], [0], [1], [0, 0, 1, 1], [], []>} : vector<128x128xbf16>, vector<128x128xbf16>, vector<128x128xf32> -> vector<128x128xf32>
    %c0_7 = arith.constant 0 : index
    %c0_8 = arith.constant 0 : index
    %12 = vector.load %arg5[%c0_7, %c0_8] : memref<128x1xf32, #tpu.memory_space<vmem>>, vector<128x1xf32>
    %13 = vector.broadcast %12 : vector<128x1xf32> to vector<128x128xf32>
    %14 = arith.addf %11, %13 : vector<128x128xf32>
    %15 = math.tanh %14 : vector<128x128xf32>
    %c0_9 = arith.constant 0 : index
    %c0_10 = arith.constant 0 : index
    %16 = vector.load %arg6[%c0_9, %c0_10] : memref<8x128xbf16, #tpu.memory_space<vmem>>, vector<8x128xbf16>
    %17 = arith.truncf %15 : vector<128x128xf32> to vector<128x128xbf16>
    %cst_11 = arith.constant dense<0.000000e+00> : vector<8x128xf32>
    %18 = tpu.matmul %16, %17, %cst_11 {dimension_numbers = #tpu.dot_dimension_numbers<[1], [0], [0], [1], [0, 0, 1, 1], [], []>} : vector<8x128xbf16>, vector<128x128xbf16>, vector<8x128xf32> -> vector<8x128xf32>
    %c0_12 = arith.constant 0 : index
    %c0_13 = arith.constant 0 : index
    %19 = vector.load %arg7[%c0_12, %c0_13] : memref<8x1xf32, #tpu.memory_space<vmem>>, vector<8x1xf32>
    %20 = vector.broadcast %19 : vector<8x1xf32> to vector<8x128xf32>
    %21 = arith.addf %18, %20 : vector<8x128xf32>
    %c0_14 = arith.constant 0 : index
    %c0_15 = arith.constant 0 : index
    %22 = vector.load %arg8[%c0_14, %c0_15] : memref<8x128xf32, #tpu.memory_space<vmem>>, vector<8x128xf32>
    tpu.vector_store %arg8[%c0_14, %c0_15], %21 {strides = array<i32>} : memref<8x128xf32, #tpu.memory_space<vmem>>, vector<8x128xf32>,
    return
  }
  func.func @transform_0(%arg0: i32) -> (i32, i32) {
    %c0_i32 = arith.constant 0 : i32
    %c0_i32_0 = arith.constant 0 : i32
    return %c0_i32, %arg0 : i32, i32
  }
  func.func @transform_1(%arg0: i32) -> (i32, i32) {
    %c0_i32 = arith.constant 0 : i32
    %c0_i32_0 = arith.constant 0 : i32
    %c0_i32_1 = arith.constant 0 : i32
    return %c0_i32, %c0_i32_0 : i32, i32
  }
  func.func @transform_2(%arg0: i32) -> (i32, i32) {
    %c0_i32 = arith.constant 0 : i32
    %c0_i32_0 = arith.constant 0 : i32
    %c0_i32_1 = arith.constant 0 : i32
    return %c0_i32, %c0_i32_0 : i32, i32
  }
  func.func @transform_3(%arg0: i32) -> (i32, i32) {
    %c0_i32 = arith.constant 0 : i32
    %c0_i32_0 = arith.constant 0 : i32
    %c0_i32_1 = arith.constant 0 : i32
    return %c0_i32, %c0_i32_0 : i32, i32
  }
  func.func @transform_4(%arg0: i32) -> (i32, i32) {
    %c0_i32 = arith.constant 0 : i32
    %c0_i32_0 = arith.constant 0 : i32
    %c0_i32_1 = arith.constant 0 : i32
    return %c0_i32, %c0_i32_0 : i32, i32
  }
  func.func @transform_5(%arg0: i32) -> (i32, i32) {
    %c0_i32 = arith.constant 0 : i32
    %c0_i32_0 = arith.constant 0 : i32
    %c0_i32_1 = arith.constant 0 : i32
    return %c0_i32, %c0_i32_0 : i32, i32
  }
  func.func @transform_6(%arg0: i32) -> (i32, i32) {
    %c0_i32 = arith.constant 0 : i32
    %c0_i32_0 = arith.constant 0 : i32
    %c0_i32_1 = arith.constant 0 : i32
    return %c0_i32, %c0_i32_0 : i32, i32
  }
  func.func @transform_7(%arg0: i32) -> (i32, i32) {
    %c0_i32 = arith.constant 0 : i32
    %c0_i32_0 = arith.constant 0 : i32
    return %c0_i32, %arg0 : i32, i32
  }
}

</mosaic_0001>

<bundles_post_ra>
// kernel: small_nn_forward.1
= control target key start
LH: loop header
LB: loop body
LE: loop exit
PB: predicated region body
PF: predicated region fallthrough
CT: control target
= control target key end

     0   :  { %v778_v0 = vmov 0   ;;  %vm780_vm0 = vmmov 0   ;;  %s1028_s2 = inlined_call_operand.vmem [shape: f32[128,1], index: 2, kind: input, shape index: {}]   ;;  %s1029_s1 = inlined_call_operand.vmem [shape: f32[128,1], index: 1, kind: input, shape index: {}]   ;;  %s1030_s4 = inlined_call_operand.vmem [shape: f32[128,1], index: 4, kind: input, shape index: {}]   ;;  %s1031_s3 = inlined_call_operand.vmem [shape: bf16[128,128], index: 3, kind: input, shape index: {}]   ;;  %s1032_s6 = inlined_call_operand.vmem [shape: f32[8,1], index: 6, kind: input, shape index: {}]   ;;  %s1033_s0 = inlined_call_operand.vmem [shape: f32[1,128], index: 0, kind: input, shape index: {}]   ;;  %s1034_s5 = inlined_call_operand.vmem [shape: bf16[8,128], index: 5, kind: input, shape index: {}]   ;;  %s1035_s7 = inlined_call_operand.vmem [shape: f32[8,128], index: 7, kind: output, shape index: {}]  }
   0x1   :  { %705 = vset.pattern.permute.xlu1 %v778_v0  ;;  %704 = vset.pattern.permute.xlu0 %v778_v0  ;;  %v44_v1 = vld [vmem:[%s1028_s2] sm:$0xff]  ;;  %v45_v3 = vld [vmem:[%s1028_s2 + $0x8] sm:$0xff]  ;;  %v31_v5 = vld [vmem:[%s1029_s1 + $0x18] sm:$0xff] }
   0x2   :  { %v28_v2 = vld [vmem:[%s1029_s1] sm:$0xff]  ;;  %164 = vperm.xlu1 %705, %v44_v1   ;;  %v29_v4 = vld [vmem:[%s1029_s1 + $0x8] sm:$0xff]  ;;  %v30_v6 = vld [vmem:[%s1029_s1 + $0x10] sm:$0xff] }
   0x3   :  { %62 = vperm.xlu0 %704, %v28_v2   ;;  %v47_v7 = vld [vmem:[%s1028_s2 + $0x18] sm:$0xff]  ;;  %v46_v8 = vld [vmem:[%s1028_s2 + $0x10] sm:$0xff]  ;;  %v33_v9 = vld [vmem:[%s1029_s1 + $0x28] sm:$0xff] }
   0x4   :  { %v32_v10 = vld [vmem:[%s1029_s1 + $0x20] sm:$0xff]  ;;  %v49_v11 = vld [vmem:[%s1028_s2 + $0x28] sm:$0xff]  ;;  %v35_v13 = vld [vmem:[%s1029_s1 + $0x38] sm:$0xff] }
   0x5   :  { %v48_v12 = vld [vmem:[%s1028_s2 + $0x20] sm:$0xff]  ;;  %v34_v14 = vld [vmem:[%s1029_s1 + $0x30] sm:$0xff]  ;;  %v51_v15 = vld [vmem:[%s1028_s2 + $0x38] sm:$0xff] }
   0x6   :  { %169 = vperm.xlu1 %705, %v45_v3   ;;  %v50_v16 = vld [vmem:[%s1028_s2 + $0x30] sm:$0xff]  ;;  %v37_v17 = vld [vmem:[%s1029_s1 + $0x48] sm:$0xff]  ;;  %v36_v18 = vld [vmem:[%s1029_s1 + $0x40] sm:$0xff] }
   0x7   :  { %67 = vperm.xlu0 %704, %v29_v4   ;;  %v53_v19 = vld [vmem:[%s1028_s2 + $0x48] sm:$0xff]  ;;  %v52_v20 = vld [vmem:[%s1028_s2 + $0x40] sm:$0xff]  ;;  %v39_v21 = vld [vmem:[%s1029_s1 + $0x58] sm:$0xff] }
   0x8   :  { %v38_v22 = vld [vmem:[%s1029_s1 + $0x50] sm:$0xff]  ;;  %v55_v23 = vld [vmem:[%s1028_s2 + $0x58] sm:$0xff]  ;;  %v41_v25 = vld [vmem:[%s1029_s1 + $0x68] sm:$0xff] }
   0x9   :  { %v54_v24 = vld [vmem:[%s1028_s2 + $0x50] sm:$0xff]  ;;  %v40_v26 = vld [vmem:[%s1029_s1 + $0x60] sm:$0xff]  ;;  %v57_v27 = vld [vmem:[%s1028_s2 + $0x68] sm:$0xff] }
   0xa   :  { %77 = vperm.xlu1 %705, %v31_v5   ;;  %v56_v28 = vld [vmem:[%s1028_s2 + $0x60] sm:$0xff]  ;;  %v43_v29 = vld [vmem:[%s1029_s1 + $0x78] sm:$0xff]  ;;  %v42_v30 = vld [vmem:[%s1029_s1 + $0x70] sm:$0xff] }
   0xb   :  { %72 = vperm.xlu0 %704, %v30_v6   ;;  %v59_v31 = vld [vmem:[%s1028_s2 + $0x78] sm:$0xff]  ;;  %v58_v32 = vld [vmem:[%s1028_s2 + $0x70] sm:$0xff]  ;;  %v299_v33 = vld [vmem:[%s1030_s4 + $0x8] sm:$0xff] }
   0xc   :  { %v298_v34 = vld [vmem:[%s1030_s4] sm:$0xff]  ;;  %v301_v35 = vld [vmem:[%s1030_s4 + $0x18] sm:$0xff]  ;;  %v300_v36 = vld [vmem:[%s1030_s4 + $0x10] sm:$0xff] }
   0xd   :  { %v303_v37 = vld [vmem:[%s1030_s4 + $0x28] sm:$0xff]  ;;  %v302_v38 = vld [vmem:[%s1030_s4 + $0x20] sm:$0xff]  ;;  %v305_v39 = vld [vmem:[%s1030_s4 + $0x38] sm:$0xff] }
   0xe   :  { %179 = vperm.xlu1 %705, %v47_v7   ;;  %v304_v40 = vld [vmem:[%s1030_s4 + $0x30] sm:$0xff]  ;;  %v307_v41 = vld [vmem:[%s1030_s4 + $0x48] sm:$0xff]  ;;  %v306_v42 = vld [vmem:[%s1030_s4 + $0x40] sm:$0xff] }
   0xf   :  { %174 = vperm.xlu0 %704, %v46_v8   ;;  %v706_v43 = vld [vmem:[%s1031_s3] sm:$0xff]   ;;  %v309_v44 = vld [vmem:[%s1030_s4 + $0x58] sm:$0xff]  ;;  %v308_v45 = vld [vmem:[%s1030_s4 + $0x50] sm:$0xff] }
  0x10   :  { %665 = vmatprep.mubr.bf16.mxu0 %v706_v43  ;;  %v311_v46 = vld [vmem:[%s1030_s4 + $0x68] sm:$0xff]  ;;  %v310_v47 = vld [vmem:[%s1030_s4 + $0x60] sm:$0xff]  ;;  %v313_v48 = vld [vmem:[%s1030_s4 + $0x78] sm:$0xff] }
  0x11   :  { %v312_v49 = vld [vmem:[%s1030_s4 + $0x70] sm:$0xff]  ;;  %v564_v50 = vld [vmem:[%s1032_s6] sm:$0xff] }
  0x12   :  { %87 = vperm.xlu1 %705, %v33_v9   ;;  %v974_v51 = vld [vmem:[%s1033_s0] ss:$0 sm:$0xff] }
  0x13   :  { %82 = vperm.xlu0 %704, %v32_v10  }
  0x16   :  { %189 = vperm.xlu1 %705, %v49_v11  }
  0x17   :  { %184 = vperm.xlu0 %704, %v48_v12  }
  0x1a   :  { %97 = vperm.xlu1 %705, %v35_v13  }
  0x1b   :  { %92 = vperm.xlu0 %704, %v34_v14  }
  0x1e   :  { %199 = vperm.xlu1 %705, %v51_v15  }
  0x1f   :  { %194 = vperm.xlu0 %704, %v50_v16  }
  0x22   :  { %107 = vperm.xlu1 %705, %v37_v17  }
  0x23   :  { %102 = vperm.xlu0 %704, %v36_v18  }
  0x26   :  { %209 = vperm.xlu1 %705, %v53_v19  }
  0x27   :  { %204 = vperm.xlu0 %704, %v52_v20  }
  0x2a   :  { %117 = vperm.xlu1 %705, %v39_v21  }
  0x2b   :  { %112 = vperm.xlu0 %704, %v38_v22  }
  0x2e   :  { %219 = vperm.xlu1 %705, %v55_v23  }
  0x2f   :  { %214 = vperm.xlu0 %704, %v54_v24  }
  0x32   :  { %127 = vperm.xlu1 %705, %v41_v25  }
  0x33   :  { %122 = vperm.xlu0 %704, %v40_v26  }
  0x36   :  { %229 = vperm.xlu1 %705, %v57_v27  }
  0x37   :  { %224 = vperm.xlu0 %704, %v56_v28  }
  0x3a   :  { %137 = vperm.xlu1 %705, %v43_v29  }
  0x3b   :  { %132 = vperm.xlu0 %704, %v42_v30  }
  0x3e   :  { %239 = vperm.xlu1 %705, %v59_v31  }
  0x3f   :  { %234 = vperm.xlu0 %704, %v58_v32  }
  0x42   :  { %321 = vperm.xlu1 %705, %v299_v33  }
  0x43   :  { %316 = vperm.xlu0 %704, %v298_v34  }
  0x46   :  { %331 = vperm.xlu1 %705, %v301_v35  }
  0x47   :  { %326 = vperm.xlu0 %704, %v300_v36  }
  0x4a   :  { %341 = vperm.xlu1 %705, %v303_v37  }
  0x4b   :  { %336 = vperm.xlu0 %704, %v302_v38  }
  0x4e   :  { %351 = vperm.xlu1 %705, %v305_v39  }
  0x4f   :  { %346 = vperm.xlu0 %704, %v304_v40  }
  0x52   :  { %361 = vperm.xlu1 %705, %v307_v41  }
  0x53   :  { %356 = vperm.xlu0 %704, %v306_v42  }
  0x56   :  { %371 = vperm.xlu1 %705, %v309_v44  }
  0x57   :  { %366 = vperm.xlu0 %704, %v308_v45  }
  0x5a   :  { %381 = vperm.xlu1 %705, %v311_v46  }
  0x5b   :  { %376 = vperm.xlu0 %704, %v310_v47  }
  0x5e   :  { %391 = vperm.xlu1 %705, %v313_v48  }
  0x5f   :  { %386 = vperm.xlu0 %704, %v312_v49  }
  0x63   :  { %567 = vperm.xlu0 %704, %v564_v50  }
  0x81   :  { %v165_v52 = vpop.permute.xlu1 %164 }
  0x82   :  { %v63_v53 = vpop.permute.xlu0 %62 }
  0x83   :  { %v146_v54 = vmul.f32 %v974_v51, %v63_v53 }
  0x85   :  { %v242_v55 = vadd.f32 %v165_v52, %v146_v54  ;;  %v170_v56 = vpop.permute.xlu1 %169 }
  0x86   :  { %v68_v57 = vpop.permute.xlu0 %67 }
  0x87   :  { %v147_v58 = vmul.f32 %v974_v51, %v68_v57  ;;  %714 = vtanh.f32 %v242_v55 }
  0x89   :  { %v243_v59 = vadd.f32 %v170_v56, %v147_v58  ;;  %v78_v60 = vpop.permute.xlu1 %77 }
  0x8a   :  { %v73_v61 = vpop.permute.xlu0 %72  ;;  %v149_v62 = vmul.f32 %v974_v51, %v78_v60 }
  0x8b   :  { %716 = vtanh.f32 %v243_v59  ;;  %v148_v63 = vmul.f32 %v974_v51, %v73_v61 }
  0x8d   :  { %v180_v0 = vpop.permute.xlu1 %179 }
  0x8e   :  { %v175_v1 = vpop.permute.xlu0 %174  ;;  %v245_v2 = vadd.f32 %v180_v0, %v149_v62 }
  0x8f   :  { %v244_v3 = vadd.f32 %v175_v1, %v148_v63 }
  0x90   :  { %718 = vtanh.f32 %v245_v2 }
  0x91   :  { %720 = vtanh.f32 %v244_v3  ;;  %v88_v4 = vpop.permute.xlu1 %87  ;;  %v715_v6 = vpop.eup %714 }
  0x92   :  { %v83_v5 = vpop.permute.xlu0 %82  ;;  %v151_v8 = vmul.f32 %v974_v51, %v88_v4 }
  0x93   :  { %v150_v9 = vmul.f32 %v974_v51, %v83_v5 }
  0x95   :  { %v717_v7 = vpop.eup %716  ;;  %v190_v10 = vpop.permute.xlu1 %189 }
  0x96   :  { %v185_v11 = vpop.permute.xlu0 %184  ;;  %v290_v12 = vpack.c.bf16 %v717_v7, %v715_v6  ;;  %v247_v13 = vadd.f32 %v190_v10, %v151_v8 }
  0x97   :  { %v246_v14 = vadd.f32 %v185_v11, %v150_v9 }
  0x98   :  { %649 = vmatprep.subr.bf16.mxu0 %v290_v12  ;;  %722 = vtanh.f32 %v247_v13  ;;  %v708_v13 = vld [vmem:[%s1031_s3 + $0x10] sm:$0xff]  }
  0x99   :  { %650 = vmatpush3.bf16.msra.mxu0 %v290_v12  ;;  %724 = vtanh.f32 %v246_v14  ;;  %v98_v15 = vpop.permute.xlu1 %97  ;;  %v709_v14 = vld [vmem:[%s1031_s3 + $0x18] sm:$0xff]  }
  0x9a   :  { %v93_v16 = vpop.permute.xlu0 %92  ;;  %v719_v17 = vpop.eup %718  ;;  %v153_v19 = vmul.f32 %v974_v51, %v98_v15  ;;  %v710_v15 = vld [vmem:[%s1031_s3 + $0x20] sm:$0xff]  }
  0x9b   :  { %v721_v18 = vpop.eup %720  ;;  %v152_v20 = vmul.f32 %v974_v51, %v93_v16  ;;  %v711_v16 = vld [vmem:[%s1031_s3 + $0x28] sm:$0xff]  }
  0x9c   :  { %v291_v21 = vpack.c.bf16 %v719_v17, %v721_v18  ;;  %v712_v17 = vld [vmem:[%s1031_s3 + $0x30] sm:$0xff]   ;;  %v713_v18 = vld [vmem:[%s1031_s3 + $0x38] sm:$0xff]  }
  0x9d   :  { %v200_v22 = vpop.permute.xlu1 %199 }
  0x9e   :  { %v195_v23 = vpop.permute.xlu0 %194  ;;  %v249_v24 = vadd.f32 %v200_v22, %v153_v19  ;;  %651 = vmatprep.subr.bf16.mxu0 %v291_v21  ;;  %v779_v19 = vmov 0.0  }
  0x9f   :  { %v248_v25 = vadd.f32 %v195_v23, %v152_v20  ;;  %652 = vmatpush3.bf16.msra.mxu0 %v291_v21  ;;  %681 = vmatprep.subr.bf16.mxu1 %v779_v19 }
  0xa0   :  { %726 = vtanh.f32 %v249_v24  ;;  %697 = vmatprep.mubr.msk.bf16.mxu1 %vm780_vm0, %v779_v19 }
  0xa1   :  { %728 = vtanh.f32 %v248_v25  ;;  %v108_v26 = vpop.permute.xlu1 %107 }
  0xa2   :  { %v103_v27 = vpop.permute.xlu0 %102  ;;  %v723_v28 = vpop.eup %722  ;;  %v155_v30 = vmul.f32 %v974_v51, %v108_v26 }
  0xa3   :  { %v725_v29 = vpop.eup %724  ;;  %v154_v31 = vmul.f32 %v974_v51, %v103_v27 }
  0xa4   :  { %v292_v32 = vpack.c.bf16 %v723_v28, %v725_v29 }
  0xa5   :  { %v210_v33 = vpop.permute.xlu1 %209 }
  0xa6   :  { %v205_v34 = vpop.permute.xlu0 %204  ;;  %v251_v35 = vadd.f32 %v210_v33, %v155_v30  ;;  %653 = vmatprep.subr.bf16.mxu0 %v292_v32 }
  0xa7   :  { %v250_v36 = vadd.f32 %v205_v34, %v154_v31  ;;  %654 = vmatpush3.bf16.msra.mxu0 %v292_v32 }
  0xa8   :  { %730 = vtanh.f32 %v251_v35 }
  0xa9   :  { %732 = vtanh.f32 %v250_v36  ;;  %v118_v37 = vpop.permute.xlu1 %117 }
  0xaa   :  { %v113_v38 = vpop.permute.xlu0 %112  ;;  %v727_v39 = vpop.eup %726  ;;  %v157_v41 = vmul.f32 %v974_v51, %v118_v37 }
  0xab   :  { %v729_v40 = vpop.eup %728  ;;  %v156_v42 = vmul.f32 %v974_v51, %v113_v38 }
  0xac   :  { %v293_v43 = vpack.c.bf16 %v727_v39, %v729_v40 }
  0xad   :  { %v220_v44 = vpop.permute.xlu1 %219 }
  0xae   :  { %v215_v45 = vpop.permute.xlu0 %214  ;;  %v253_v46 = vadd.f32 %v220_v44, %v157_v41  ;;  %655 = vmatprep.subr.bf16.mxu0 %v293_v43 }
  0xaf   :  { %v252_v47 = vadd.f32 %v215_v45, %v156_v42  ;;  %656 = vmatpush3.bf16.msra.mxu0 %v293_v43 }
  0xb0   :  { %734 = vtanh.f32 %v253_v46 }
  0xb1   :  { %736 = vtanh.f32 %v252_v47  ;;  %v128_v48 = vpop.permute.xlu1 %127 }
  0xb2   :  { %v123_v49 = vpop.permute.xlu0 %122  ;;  %v731_v50 = vpop.eup %730  ;;  %v159_v53 = vmul.f32 %v974_v51, %v128_v48 }
  0xb3   :  { %v733_v52 = vpop.eup %732  ;;  %v158_v54 = vmul.f32 %v974_v51, %v123_v49 }
  0xb4   :  { %v294_v55 = vpack.c.bf16 %v731_v50, %v733_v52 }
  0xb5   :  { %v230_v56 = vpop.permute.xlu1 %229 }
  0xb6   :  { %v225_v57 = vpop.permute.xlu0 %224  ;;  %v255_v58 = vadd.f32 %v230_v56, %v159_v53  ;;  %657 = vmatprep.subr.bf16.mxu0 %v294_v55 }
  0xb7   :  { %v254_v59 = vadd.f32 %v225_v57, %v158_v54  ;;  %658 = vmatpush3.bf16.msra.mxu0 %v294_v55 }
  0xb8   :  { %738 = vtanh.f32 %v255_v58 }
  0xb9   :  { %740 = vtanh.f32 %v254_v59  ;;  %v138_v60 = vpop.permute.xlu1 %137 }
  0xba   :  { %v133_v61 = vpop.permute.xlu0 %132  ;;  %v735_v62 = vpop.eup %734  ;;  %v161_v0 = vmul.f32 %v974_v51, %v138_v60 }
  0xbb   :  { %v737_v63 = vpop.eup %736  ;;  %v160_v1 = vmul.f32 %v974_v51, %v133_v61  ;;  %v707_v51 = vld [vmem:[%s1031_s3 + $0x8] sm:$0xff]  }
  0xbc   :  { %v295_v2 = vpack.c.bf16 %v735_v62, %v737_v63 }
  0xbd   :  { %v240_v3 = vpop.permute.xlu1 %239 }
  0xbe   :  { %v235_v4 = vpop.permute.xlu0 %234  ;;  %v257_v5 = vadd.f32 %v240_v3, %v161_v0  ;;  %659 = vmatprep.subr.bf16.mxu0 %v295_v2 }
  0xbf   :  { %v256_v6 = vadd.f32 %v235_v4, %v160_v1  ;;  %660 = vmatpush3.bf16.msra.mxu0 %v295_v2 }
  0xc0   :  { %742 = vtanh.f32 %v257_v5 }
  0xc1   :  { %744 = vtanh.f32 %v256_v6  ;;  %v322_v21 = vpop.permute.xlu1 %321 }
  0xc2   :  { %v739_v7 = vpop.eup %738  ;;  %v317_v20 = vpop.permute.xlu0 %316 }
  0xc3   :  { %v741_v8 = vpop.eup %740 }
  0xc4   :  { %v296_v9 = vpack.c.bf16 %v739_v7, %v741_v8 }
  0xc5   :  { %v332_v23 = vpop.permute.xlu1 %331 }
  0xc6   :  { %661 = vmatprep.subr.bf16.mxu0 %v296_v9  ;;  %v327_v22 = vpop.permute.xlu0 %326 }
  0xc7   :  { %662 = vmatpush3.bf16.msra.mxu0 %v296_v9 }
  0xc9   :  { %v342_v25 = vpop.permute.xlu1 %341 }
  0xca   :  { %v743_v10 = vpop.eup %742  ;;  %v337_v24 = vpop.permute.xlu0 %336 }
  0xcb   :  { %v745_v11 = vpop.eup %744 }
  0xcc   :  { %v297_v12 = vpack.c.bf16 %v743_v10, %v745_v11 }
  0xcd   :  { %v352_v30 = vpop.permute.xlu1 %351 }
  0xce   :  { %663 = vmatprep.subr.bf16.mxu0 %v297_v12  ;;  %v347_v26 = vpop.permute.xlu0 %346 }
  0xcf   :  { %664 = vmatpush3.bf16.msra.mxu0 %v297_v12 }
  0xd1   :  { %v362_v37 = vpop.permute.xlu1 %361 }
  0xd2   :  { %666 = vmatmul.mubr.bf16.vlgmr.msra.gmra.mrb[0].mxu0 %v707_v51  ;;  %v357_v36 = vpop.permute.xlu0 %356 }
  0xd3   :  { %669 = vmatprep.mubr.bf16.mxu0 %v708_v13 }
  0xd5   :  { %v372_v49 = vpop.permute.xlu1 %371 }
  0xd6   :  { %v367_v45 = vpop.permute.xlu0 %366 }
  0xd9   :  { %v382_v63 = vpop.permute.xlu1 %381 }
  0xda   :  { %670 = vmatmul.mubr.bf16.gmra.mrb[4].mxu0 %v709_v14  ;;  %v377_v58 = vpop.permute.xlu0 %376 }
  0xdb   :  { %673 = vmatprep.mubr.bf16.mxu0 %v710_v15 }
  0xdd   :  { %v392_v11 = vpop.permute.xlu1 %391 }
  0xde   :  { %v387_v5 = vpop.permute.xlu0 %386 }
  0xe2   :  { %674 = vmatmul.mubr.bf16.gmra.mrb[8].mxu0 %v711_v16 }
  0xe3   :  { %677 = vmatprep.mubr.bf16.mxu0 %v712_v17 }
  0xea   :  { %678 = vmatmul.mubr.bf16.gmra.mrb[12].mxu0 %v713_v18 }
 0x1a5   :  { %v667_v27 = vpop.f32.mrb[0].mxu0 }
 0x1a6   :  { %v485_v28 = vadd.f32 %v667_v27, %v327_v22  ;;  %v476_v29 = vpop.f32.mrb[1].mxu0 }
 0x1a7   :  { %v477_v31 = vadd.f32 %v476_v29, %v317_v20  ;;  %v668_v32 = vpop.f32.mrb[2].mxu0  ;;  %v555_v29 = vld [vmem:[%s1034_s5] sm:$0xf] }
 0x1a8   :  { %746 = vtanh.f32 %v485_v28  ;;  %v488_v33 = vadd.f32 %v668_v32, %v332_v23  ;;  %v479_v34 = vpop.f32.mrb[3].mxu0 }
 0x1a9   :  { %748 = vtanh.f32 %v477_v31  ;;  %v480_v35 = vadd.f32 %v479_v34, %v322_v21 }
 0x1aa   :  { %750 = vtanh.f32 %v488_v33 }
 0x1ab   :  { %752 = vtanh.f32 %v480_v35 }
 0x1ad   :  { %v671_v38 = vpop.f32.mrb[4].mxu0 }
 0x1ae   :  { %v501_v39 = vadd.f32 %v671_v38, %v347_v26  ;;  %v492_v40 = vpop.f32.mrb[5].mxu0 }
 0x1af   :  { %v493_v41 = vadd.f32 %v492_v40, %v337_v24  ;;  %v672_v42 = vpop.f32.mrb[6].mxu0 }
 0x1b0   :  { %754 = vtanh.f32 %v501_v39  ;;  %v504_v43 = vadd.f32 %v672_v42, %v352_v30  ;;  %v495_v44 = vpop.f32.mrb[7].mxu0  ;;  %v568_v30 = vpop.permute.xlu0 %567 }
 0x1b1   :  { %756 = vtanh.f32 %v493_v41  ;;  %v496_v46 = vadd.f32 %v495_v44, %v342_v25 }
 0x1b2   :  { %v747_v47 = vpop.eup %746  ;;  %758 = vtanh.f32 %v504_v43 }
 0x1b3   :  { %v749_v48 = vpop.eup %748  ;;  %760 = vtanh.f32 %v496_v46 }
 0x1b4   :  { %v751_v50 = vpop.eup %750 }
 0x1b5   :  { %v753_v52 = vpop.eup %752  ;;  %v675_v53 = vpop.f32.mrb[8].mxu0  ;;  %v557_v54 = vpack.c.bf16 %v751_v50, %v747_v47 }
 0x1b6   :  { %v517_v55 = vadd.f32 %v675_v53, %v367_v45  ;;  %v508_v56 = vpop.f32.mrb[9].mxu0  ;;  %v556_v57 = vpack.c.bf16 %v753_v52, %v749_v48 }
 0x1b7   :  { %v509_v59 = vadd.f32 %v508_v56, %v357_v36  ;;  %v676_v60 = vpop.f32.mrb[10].mxu0 }
 0x1b8   :  { %762 = vtanh.f32 %v517_v55  ;;  %v520_v61 = vadd.f32 %v676_v60, %v372_v49  ;;  %v511_v62 = vpop.f32.mrb[11].mxu0  ;;  %682 = vmatpush3.bf16.msra.mxu1 %v556_v57 }
 0x1b9   :  { %764 = vtanh.f32 %v509_v59  ;;  %v512_v0 = vadd.f32 %v511_v62, %v362_v37  ;;  %683 = vmatprep.subr.bf16.mxu1 %v779_v19 }
 0x1ba   :  { %v755_v1 = vpop.eup %754  ;;  %766 = vtanh.f32 %v520_v61 }
 0x1bb   :  { %v757_v2 = vpop.eup %756  ;;  %768 = vtanh.f32 %v512_v0 }
 0x1bc   :  { %v759_v3 = vpop.eup %758  ;;  %684 = vmatpush3.bf16.msra.mxu1 %v557_v54 }
 0x1bd   :  { %v761_v4 = vpop.eup %760  ;;  %v679_v6 = vpop.f32.mrb[12].mxu0  ;;  %685 = vmatprep.subr.bf16.mxu1 %v779_v19  ;;  %v559_v7 = vpack.c.bf16 %v759_v3, %v755_v1 }
 0x1be   :  { %v533_v8 = vadd.f32 %v679_v6, %v387_v5  ;;  %v524_v9 = vpop.f32.mrb[13].mxu0  ;;  %v558_v10 = vpack.c.bf16 %v761_v4, %v757_v2 }
 0x1bf   :  { %v525_v12 = vadd.f32 %v524_v9, %v377_v58  ;;  %v680_v51 = vpop.f32.mrb[14].mxu0 }
 0x1c0   :  { %770 = vtanh.f32 %v533_v8  ;;  %v536_v13 = vadd.f32 %v680_v51, %v392_v11  ;;  %v527_v14 = vpop.f32.mrb[15].mxu0  ;;  %686 = vmatpush3.bf16.msra.mxu1 %v558_v10 }
 0x1c1   :  { %772 = vtanh.f32 %v525_v12  ;;  %v528_v15 = vadd.f32 %v527_v14, %v382_v63  ;;  %687 = vmatprep.subr.bf16.mxu1 %v779_v19 }
 0x1c2   :  { %v763_v16 = vpop.eup %762  ;;  %774 = vtanh.f32 %v536_v13 }
 0x1c3   :  { %v765_v17 = vpop.eup %764  ;;  %776 = vtanh.f32 %v528_v15 }
 0x1c4   :  { %v767_v18 = vpop.eup %766  ;;  %688 = vmatpush3.bf16.msra.mxu1 %v559_v7 }
 0x1c5   :  { %v769_v20 = vpop.eup %768  ;;  %689 = vmatprep.subr.bf16.mxu1 %v779_v19  ;;  %v561_v21 = vpack.c.bf16 %v767_v18, %v763_v16 }
 0x1c6   :  { %v560_v22 = vpack.c.bf16 %v769_v20, %v765_v17 }
 0x1c8   :  { %690 = vmatpush3.bf16.msra.mxu1 %v560_v22 }
 0x1c9   :  { %691 = vmatprep.subr.bf16.mxu1 %v779_v19 }
 0x1ca   :  { %v771_v23 = vpop.eup %770 }
 0x1cb   :  { %v773_v24 = vpop.eup %772 }
 0x1cc   :  { %v775_v25 = vpop.eup %774  ;;  %692 = vmatpush3.bf16.msra.mxu1 %v561_v21 }
 0x1cd   :  { %v777_v26 = vpop.eup %776  ;;  %693 = vmatprep.subr.bf16.mxu1 %v779_v19  ;;  %v563_v27 = vpack.c.bf16 %v775_v25, %v771_v23 }
 0x1ce   :  { %v562_v28 = vpack.c.bf16 %v777_v26, %v773_v24 }
 0x1d0   :  { %694 = vmatpush3.bf16.msra.mxu1 %v562_v28 }
 0x1d1   :  { %695 = vmatprep.subr.bf16.mxu1 %v779_v19 }
 0x1d4   :  { %696 = vmatpush3.bf16.msra.mxu1 %v563_v27 }
 0x1d7   :  { %698 = vmatmul.mubr.bf16.vlgmr.msra.gmra.mrb[0].mxu1 %v555_v29 }
 0x2aa   :  { %v604_v31 = vpop.f32.mrb[0].mxu1 }
 0x2ab   :  { %v605_v32 = vadd.f32 %v604_v31, %v568_v30  ;;  %v699_v33 = vpop.f32.mrb[1].mxu1 }
 0x2ac   :  { %v607_v34 = vpop.f32.mrb[2].mxu1 }
 0x2ad   :  { %610 = vst [vmem:[%s1035_s7] sm:$0xff] %v605_v32  ;;  %v700_v35 = vpop.f32.mrb[3].mxu1 }

</bundles_post_ra>
